<compile_context>
chip_gen: v7x
topology: tpu7x:2x2x1
jax: 0.10.0
libtpu: 0.0.40
codegen_flags: <defaults>
</compile_context>

<pallas_src>
import functools

import jax
import jax.numpy as jnp
import numpy as np
from jax.experimental import pallas as pl
from jax.experimental.pallas import tpu as pltpu

WIDTH = 20          # MLP hidden width (from the PyTorch module)
DEPTH = 6           # number of Linear layers per MLP (from the PyTorch module)
K_PAD = 32          # padded contraction dim per layer (>= max(k, n, WIDTH))
N_PAD = 128         # padded output / lane dim per layer (>= max(WIDTH, p))
LAST_BRANCH = False
LAST_TRUNK = False


# --------------------------------------------------------------------------- #
# Pallas kernel: one grid step = one Linear layer of BOTH MLPs.
# Grid = (batch_tiles, DEPTH); the layer axis pipelines the per-layer weight DMA
# against the previous layer's compute. The final DeepONet reduction is emitted
# on the last layer step.
# --------------------------------------------------------------------------- #
def deeponet_kernel(bx_ref, tx_ref, bw_ref, bb_ref, tw_ref, tb_ref, out_ref,
                    b_act, t_act, *, p, last_branch, last_trunk):
    layer = pl.program_id(1)
    n_layers = pl.num_programs(1)

    # Seed the carried activations from the (padded) network inputs.
    @pl.when(layer == 0)
    def _():
        b_act[...] = bx_ref[...]
        t_act[...] = tx_ref[...]

    def layer_step(act_ref, w_ref, b_ref):
        # Only the first K_PAD lanes of the activation feed the next layer.
        x = act_ref[:, :K_PAD].astype(jnp.bfloat16)                 # (TB, 32)
        h = jnp.dot(x, w_ref[0], preferred_element_type=jnp.float32)  # bf16 MXU, f32 acc
        return h + b_ref[0]                                          # (TB, 128) f32

    hb = layer_step(b_act, bw_ref, bb_ref)
    ht = layer_step(t_act, tw_ref, tb_ref)

    # Hidden layers: tanh, write back to the carried activations.
    @pl.when(layer < n_layers - 1)
    def _():
        b_act[...] = jnp.tanh(hb)
        t_act[...] = jnp.tanh(ht)

    # Last layer: (optional sigmoid,) lane-wise product + reduction.
    @pl.when(layer == n_layers - 1)
    def _():
        bo = jax.nn.sigmoid(hb) if last_branch else hb
        to = jax.nn.sigmoid(ht) if last_trunk else ht
        prod = bo * to
        if last_branch or last_trunk:
            # Padded lanes are nonzero only if a final sigmoid ran; mask them.
            lane_ids = jax.lax.broadcasted_iota(jnp.int32, prod.shape, 1)
            prod = jnp.where(lane_ids < p, prod, 0.0)
        # torch.sum(branch_out * trunk_out, dim=1, keepdim=True)
        out_ref[...] = jnp.sum(prod, axis=1, keepdims=True)


# --------------------------------------------------------------------------- #
# Parameter construction (deterministic, synthetic)
# --------------------------------------------------------------------------- #
def init_mlp_params(key, in_dim, out_dim):
    dims = [in_dim] + [WIDTH] * (DEPTH - 1) + [out_dim]
    Ws, bs = [], []
    for i in range(DEPTH):
        key, kw, kb = jax.random.split(key, 3)
        scale = 1.0 / jnp.sqrt(jnp.float32(dims[i]))
        Ws.append(scale * jax.random.normal(kw, (dims[i], dims[i + 1]), jnp.float32))
        bs.append(scale * jax.random.normal(kb, (dims[i + 1],), jnp.float32))
    return Ws, bs


def pad_and_stack(Ws, bs):
    """Pad weights to (K_PAD, N_PAD) bf16 and biases to (1, N_PAD) f32, stack by layer."""
    Wp, bp = [], []
    for W, b in zip(Ws, bs):
        assert W.shape[0] <= K_PAD and W.shape[1] <= N_PAD
        Wpad = jnp.zeros((K_PAD, N_PAD), jnp.float32).at[:W.shape[0], :W.shape[1]].set(W)
        bpad = jnp.zeros((1, N_PAD), jnp.float32).at[0, :b.shape[0]].set(b)
        Wp.append(Wpad.astype(jnp.bfloat16))
        bp.append(bpad)
    return jnp.stack(Wp), jnp.stack(bp)   # (DEPTH, K_PAD, N_PAD) bf16, (DEPTH, 1, N_PAD) f32


# --------------------------------------------------------------------------- #
# Wrapper that calls pallas_call
# --------------------------------------------------------------------------- #
def deeponet_forward(branch_x, trunk_x, branch_params, trunk_params, p,
                     max_tile_b=512):
    assert branch_x.shape[1] <= K_PAD and trunk_x.shape[1] <= K_PAD
    assert p <= N_PAD and WIDTH <= K_PAD

    B = branch_x.shape[0]
    tile_b = min(max_tile_b, ((B + 7) // 8) * 8)     # sublane-aligned batch tile
    nb = (B + tile_b - 1) // tile_b
    Bp = nb * tile_b

    # Inputs padded to the full lane width so the scratch seed is a plain copy.
    bx_pad = jnp.zeros((Bp, N_PAD), jnp.float32).at[:B, :branch_x.shape[1]].set(branch_x)
    tx_pad = jnp.zeros((Bp, N_PAD), jnp.float32).at[:B, :trunk_x.shape[1]].set(trunk_x)

    bW, bB = pad_and_stack(*branch_params)
    tW, tB = pad_and_stack(*trunk_params)

    kernel = functools.partial(
        deeponet_kernel, p=p, last_branch=LAST_BRANCH, last_trunk=LAST_TRUNK)

    out = pl.pallas_call(
        kernel,
        out_shape=jax.ShapeDtypeStruct((Bp, 1), jnp.float32),
        grid_spec=pltpu.PrefetchScalarGridSpec(
            num_scalar_prefetch=0,
            grid=(nb, DEPTH),                         # (batch tiles, layers)
            in_specs=[
                pl.BlockSpec((tile_b, N_PAD), lambda b, l: (b, 0)),       # branch input
                pl.BlockSpec((tile_b, N_PAD), lambda b, l: (b, 0)),       # trunk input
                pl.BlockSpec((1, K_PAD, N_PAD), lambda b, l: (l, 0, 0)),  # branch W (per layer)
                pl.BlockSpec((1, 1, N_PAD), lambda b, l: (l, 0, 0)),      # branch b
                pl.BlockSpec((1, K_PAD, N_PAD), lambda b, l: (l, 0, 0)),  # trunk W
                pl.BlockSpec((1, 1, N_PAD), lambda b, l: (l, 0, 0)),      # trunk b
            ],
            out_specs=pl.BlockSpec((tile_b, 1), lambda b, l: (b, 0)),
            scratch_shapes=[
                pltpu.VMEM((tile_b, N_PAD), jnp.float32),   # branch activation carry
                pltpu.VMEM((tile_b, N_PAD), jnp.float32),   # trunk activation carry
            ],
        ),
        compiler_params=pltpu.CompilerParams(
            dimension_semantics=("parallel", "arbitrary")),
    )(bx_pad, tx_pad, bW, bB, tW, tB)

    return out[:B]                                    # (B, 1) — matches keepdim=True


# --------------------------------------------------------------------------- #
# Pure-JAX reference (mirrors the PyTorch forward; uses the same bf16-rounded
# weights and bf16 matmul inputs as the kernel so the comparison is tight).
# --------------------------------------------------------------------------- #
def mlp_ref(x, Ws, bs, last):
    h = x
    for i in range(DEPTH):
        w = Ws[i].astype(jnp.bfloat16).astype(jnp.float32)     # same rounding as kernel
        xin = h.astype(jnp.bfloat16).astype(jnp.float32)       # same rounding as kernel
        h = xin @ w + bs[i]
        if i < DEPTH - 1:
            h = jnp.tanh(h)
    if last:
        h = jax.nn.sigmoid(h)
    return h


def deeponet_ref(branch_x, trunk_x, branch_params, trunk_params):
    b = mlp_ref(branch_x, *branch_params, LAST_BRANCH)
    t = mlp_ref(trunk_x, *trunk_params, LAST_TRUNK)
    return jnp.sum(b * t, axis=1, keepdims=True)


# --------------------------------------------------------------------------- #
if __name__ == "__main__":
    k_dim = 16      # branch network input size (sensor points)
    n_dim = 2       # trunk network input size (evaluation coordinates)
    p_dim = 32      # shared output dimension of branch / trunk networks
    batch = 4

    root = jax.random.PRNGKey(0)
    k_branch, k_trunk, k_bx, k_tx = jax.random.split(root, 4)

    branch_params = init_mlp_params(k_branch, k_dim, p_dim)
    trunk_params = init_mlp_params(k_trunk, n_dim, p_dim)

    branch_x = jax.random.normal(k_bx, (batch, k_dim), jnp.float32)
    trunk_x = jax.random.normal(k_tx, (batch, n_dim), jnp.float32)

    out = deeponet_forward(branch_x, trunk_x, branch_params, trunk_params, p_dim)
    out = jax.block_until_ready(out)

    ref = deeponet_ref(branch_x, trunk_x, branch_params, trunk_params)
    # Tolerance loosened vs. the original 1e-5: weights/activations go through
    # the MXU in bf16 (the reference mirrors the same rounding).
    np.testing.assert_allclose(np.asarray(out), np.asarray(ref), rtol=1e-3, atol=1e-3)

    print("KERNEL_OK")
</pallas_src>

<mosaic_0001>
module attributes {stable_mosaic.version = 11 : i64} {
  func.func @deeponet_kernel(%arg0: i32, %arg1: i32, %arg2: memref<8x128xf32, #tpu.memory_space<vmem>>, %arg3: memref<8x128xf32, #tpu.memory_space<vmem>>, %arg4: memref<1x32x128xbf16, #tpu.memory_space<vmem>>, %arg5: memref<1x1x128xf32, #tpu.memory_space<vmem>>, %arg6: memref<1x32x128xbf16, #tpu.memory_space<vmem>>, %arg7: memref<1x1x128xf32, #tpu.memory_space<vmem>>, %arg8: memref<8x1xf32, #tpu.memory_space<vmem>>, %arg9: memref<8x128xf32, #tpu.memory_space<vmem>>, %arg10: memref<8x128xf32, #tpu.memory_space<vmem>>) attributes {dimension_semantics = [#tpu.dimension_semantics<parallel>, #tpu.dimension_semantics<arbitrary>], iteration_bounds = array<i64: 1, 6>, scalar_prefetch = 0 : i64, scratch_operands = 2 : i64, tpu.core_type = #tpu.core_type<tc>, window_params = [{transform_indices = @transform_0, window_bounds = array<i64: 8, 128>}, {transform_indices = @transform_1, window_bounds = array<i64: 8, 128>}, {transform_indices = @transform_2, window_bounds = array<i64: 1, 32, 128>}, {transform_indices = @transform_3, window_bounds = array<i64: 1, 1, 128>}, {transform_indices = @transform_4, window_bounds = array<i64: 1, 32, 128>}, {transform_indices = @transform_5, window_bounds = array<i64: 1, 1, 128>}, {transform_indices = @transform_6, window_bounds = array<i64: 8, 1>}]} {
    %c0_i32 = arith.constant 0 : i32
    %0 = arith.cmpi eq, %arg1, %c0_i32 : i32
    %1 = arith.extui %0 : i1 to i32
    %c0_i32_0 = arith.constant 0 : i32
    %2 = arith.cmpi ne, %1, %c0_i32_0 : i32
    scf.if %2 {
      %c0_20 = arith.constant 0 : index
      %c0_21 = arith.constant 0 : index
      %27 = vector.load %arg2[%c0_20, %c0_21] : memref<8x128xf32, #tpu.memory_space<vmem>>, vector<8x128xf32>
      %c0_22 = arith.constant 0 : index
      %c0_23 = arith.constant 0 : index
      %28 = vector.load %arg9[%c0_22, %c0_23] : memref<8x128xf32, #tpu.memory_space<vmem>>, vector<8x128xf32>
      tpu.vector_store %arg9[%c0_22, %c0_23], %27 {strides = array<i32>} : memref<8x128xf32, #tpu.memory_space<vmem>>, vector<8x128xf32>,
      %c0_24 = arith.constant 0 : index
      %c0_25 = arith.constant 0 : index
      %29 = vector.load %arg3[%c0_24, %c0_25] : memref<8x128xf32, #tpu.memory_space<vmem>>, vector<8x128xf32>
      %c0_26 = arith.constant 0 : index
      %c0_27 = arith.constant 0 : index
      %30 = vector.load %arg10[%c0_26, %c0_27] : memref<8x128xf32, #tpu.memory_space<vmem>>, vector<8x128xf32>
      tpu.vector_store %arg10[%c0_26, %c0_27], %29 {strides = array<i32>} : memref<8x128xf32, #tpu.memory_space<vmem>>, vector<8x128xf32>,
    } else {
    }
    %c0 = arith.constant 0 : index
    %c0_1 = arith.constant 0 : index
    %3 = vector.load %arg9[%c0, %c0_1] : memref<8x128xf32, #tpu.memory_space<vmem>>, vector<8x32xf32>
    %4 = arith.truncf %3 : vector<8x32xf32> to vector<8x32xbf16>
    %c0_2 = arith.constant 0 : index
    %c0_3 = arith.constant 0 : index
    %c0_4 = arith.constant 0 : index
    %5 = vector.load %arg4[%c0_2, %c0_3, %c0_4] : memref<1x32x128xbf16, #tpu.memory_space<vmem>>, vector<1x32x128xbf16>
    %6 = vector.shape_cast %5 : vector<1x32x128xbf16> to vector<32x128xbf16>
    %cst = arith.constant dense<0.000000e+00> : vector<8x128xf32>
    %7 = tpu.matmul %4, %6, %cst {dimension_numbers = #tpu.dot_dimension_numbers<[1], [0], [0], [1], [0, 0, 1, 1], [], []>} : vector<8x32xbf16>, vector<32x128xbf16>, vector<8x128xf32> -> vector<8x128xf32>
    %c0_5 = arith.constant 0 : index
    %c0_6 = arith.constant 0 : index
    %c0_7 = arith.constant 0 : index
    %8 = vector.load %arg5[%c0_5, %c0_6, %c0_7] : memref<1x1x128xf32, #tpu.memory_space<vmem>>, vector<1x1x128xf32>
    %9 = vector.shape_cast %8 : vector<1x1x128xf32> to vector<1x128xf32>
    %10 = vector.broadcast %9 : vector<1x128xf32> to vector<8x128xf32>
    %11 = arith.addf %7, %10 : vector<8x128xf32>
    %c0_8 = arith.constant 0 : index
    %c0_9 = arith.constant 0 : index
    %12 = vector.load %arg10[%c0_8, %c0_9] : memref<8x128xf32, #tpu.memory_space<vmem>>, vector<8x32xf32>
    %13 = arith.truncf %12 : vector<8x32xf32> to vector<8x32xbf16>
    %c0_10 = arith.constant 0 : index
    %c0_11 = arith.constant 0 : index
    %c0_12 = arith.constant 0 : index
    %14 = vector.load %arg6[%c0_10, %c0_11, %c0_12] : memref<1x32x128xbf16, #tpu.memory_space<vmem>>, vector<1x32x128xbf16>
    %15 = vector.shape_cast %14 : vector<1x32x128xbf16> to vector<32x128xbf16>
    %cst_13 = arith.constant dense<0.000000e+00> : vector<8x128xf32>
    %16 = tpu.matmul %13, %15, %cst_13 {dimension_numbers = #tpu.dot_dimension_numbers<[1], [0], [0], [1], [0, 0, 1, 1], [], []>} : vector<8x32xbf16>, vector<32x128xbf16>, vector<8x128xf32> -> vector<8x128xf32>
    %c0_14 = arith.constant 0 : index
    %c0_15 = arith.constant 0 : index
    %c0_16 = arith.constant 0 : index
    %17 = vector.load %arg7[%c0_14, %c0_15, %c0_16] : memref<1x1x128xf32, #tpu.memory_space<vmem>>, vector<1x1x128xf32>
    %18 = vector.shape_cast %17 : vector<1x1x128xf32> to vector<1x128xf32>
    %19 = vector.broadcast %18 : vector<1x128xf32> to vector<8x128xf32>
    %20 = arith.addf %16, %19 : vector<8x128xf32>
    %c5_i32 = arith.constant 5 : i32
    %21 = arith.cmpi slt, %arg1, %c5_i32 : i32
    %22 = arith.extui %21 : i1 to i32
    %c0_i32_17 = arith.constant 0 : i32
    %23 = arith.cmpi ne, %22, %c0_i32_17 : i32
    scf.if %23 {
      %27 = math.tanh %11 : vector<8x128xf32>
      %c0_20 = arith.constant 0 : index
      %c0_21 = arith.constant 0 : index
      %28 = vector.load %arg9[%c0_20, %c0_21] : memref<8x128xf32, #tpu.memory_space<vmem>>, vector<8x128xf32>
      tpu.vector_store %arg9[%c0_20, %c0_21], %27 {strides = array<i32>} : memref<8x128xf32, #tpu.memory_space<vmem>>, vector<8x128xf32>,
      %29 = math.tanh %20 : vector<8x128xf32>
      %c0_22 = arith.constant 0 : index
      %c0_23 = arith.constant 0 : index
      %30 = vector.load %arg10[%c0_22, %c0_23] : memref<8x128xf32, #tpu.memory_space<vmem>>, vector<8x128xf32>
      tpu.vector_store %arg10[%c0_22, %c0_23], %29 {strides = array<i32>} : memref<8x128xf32, #tpu.memory_space<vmem>>, vector<8x128xf32>,
    } else {
    }
    %c5_i32_18 = arith.constant 5 : i32
    %24 = arith.cmpi eq, %arg1, %c5_i32_18 : i32
    %25 = arith.extui %24 : i1 to i32
    %c0_i32_19 = arith.constant 0 : i32
    %26 = arith.cmpi ne, %25, %c0_i32_19 : i32
    scf.if %26 {
      %27 = arith.mulf %11, %20 : vector<8x128xf32>
      %cst_20 = arith.constant dense<0.000000e+00> : vector<8xf32>
      %28 = vector.multi_reduction <add>, %27, %cst_20 [1] : vector<8x128xf32> to vector<8xf32>
      %29 = vector.shape_cast %28 : vector<8xf32> to vector<8x1xf32>
      %c0_21 = arith.constant 0 : index
      %c0_22 = arith.constant 0 : index
      %30 = vector.load %arg8[%c0_21, %c0_22] : memref<8x1xf32, #tpu.memory_space<vmem>>, vector<8x1xf32>
      tpu.vector_store %arg8[%c0_21, %c0_22], %29 {strides = array<i32>} : memref<8x1xf32, #tpu.memory_space<vmem>>, vector<8x1xf32>,
    } else {
    }
    return
  }
  func.func @transform_0(%arg0: i32, %arg1: i32) -> (i32, i32) {
    %c0_i32 = arith.constant 0 : i32
    %c0_i32_0 = arith.constant 0 : i32
    return %arg0, %c0_i32 : i32, i32
  }
  func.func @transform_1(%arg0: i32, %arg1: i32) -> (i32, i32) {
    %c0_i32 = arith.constant 0 : i32
    %c0_i32_0 = arith.constant 0 : i32
    return %arg0, %c0_i32 : i32, i32
  }
  func.func @transform_2(%arg0: i32, %arg1: i32) -> (i32, i32, i32) {
    %c0_i32 = arith.constant 0 : i32
    %c0_i32_0 = arith.constant 0 : i32
    %c0_i32_1 = arith.constant 0 : i32
    return %arg1, %c0_i32, %c0_i32_0 : i32, i32, i32
  }
  func.func @transform_3(%arg0: i32, %arg1: i32) -> (i32, i32, i32) {
    %c0_i32 = arith.constant 0 : i32
    %c0_i32_0 = arith.constant 0 : i32
    %c0_i32_1 = arith.constant 0 : i32
    return %arg1, %c0_i32, %c0_i32_0 : i32, i32, i32
  }
  func.func @transform_4(%arg0: i32, %arg1: i32) -> (i32, i32, i32) {
    %c0_i32 = arith.constant 0 : i32
    %c0_i32_0 = arith.constant 0 : i32
    %c0_i32_1 = arith.constant 0 : i32
    return %arg1, %c0_i32, %c0_i32_0 : i32, i32, i32
  }
  func.func @transform_5(%arg0: i32, %arg1: i32) -> (i32, i32, i32) {
    %c0_i32 = arith.constant 0 : i32
    %c0_i32_0 = arith.constant 0 : i32
    %c0_i32_1 = arith.constant 0 : i32
    return %arg1, %c0_i32, %c0_i32_0 : i32, i32, i32
  }
  func.func @transform_6(%arg0: i32, %arg1: i32) -> (i32, i32) {
    %c0_i32 = arith.constant 0 : i32
    %c0_i32_0 = arith.constant 0 : i32
    return %arg0, %c0_i32 : i32, i32
  }
}

</mosaic_0001>

<bundles_post_ra>
// kernel: tpu_custom_call.1
= control target key start
LH: loop header
LB: loop body
LE: loop exit
PB: predicated region body
PF: predicated region fallthrough
CT: control target
= control target key end

     0   :  { %s1309_s0 = inlined_call_operand.hbm [shape: f32[8,128], index: 0, kind: input, shape index: {}]   ;;  %s1310_s1 = inlined_call_operand.hbm [shape: f32[8,128], index: 1, kind: input, shape index: {}]   ;;  %s1311_s2 = inlined_call_operand.hbm [shape: bf16[6,32,128], index: 2, kind: input, shape index: {}]   ;;  %s1312_s3 = inlined_call_operand.vmem [shape: f32[6,1,128], index: 3, kind: input, shape index: {}]   ;;  %s1313_s4 = inlined_call_operand.hbm [shape: bf16[6,32,128], index: 4, kind: input, shape index: {}]   ;;  %s1314_s5 = inlined_call_operand.vmem [shape: f32[6,1,128], index: 5, kind: input, shape index: {}]   ;;  %s1315_s6 = inlined_call_operand.vmem [shape: f32[8,1], index: 6, kind: output, shape index: {}]  }
   0x1   :  { %1328 = sst [smem:[#allocation16_spill]] %s1309_s0 }
   0x2   :  { %1329 = sst [smem:[#allocation17_spill]] %s1311_s2 }
   0x3   :  { %11 = vsyncpa [#allocation5], 0 }
   0x4   :  { %12 = vsyncpa [#allocation7], 0  ;;  %s1044_s21 = smov 0   ;;  %s1046_s22 = smov 0  }
   0x5   :  { %s1048_s23 = smov 0   ;;  %s1050_s24 = smov 0  }
   0x6   :  { %s1052_s25 = smov 0   ;;  %s1054_s26 = smov 0  }
   0x7 LB: > { %1330 = sst [smem:[#allocation13_spill]] %s987_s23  ;;  %s1321_s27 = sadd.s32 4294967295, %s999_s26   ;;  %s999_s26 = sphi %s1054_s26, %s18_s26   ;;  %s995_s25 = sphi %s1052_s25, %s1357_s25   ;;  %s991_s24 = sphi %s1050_s24, %s1356_s24   ;;  %s987_s23 = sphi %s1048_s23, %s1352_s23   ;;  %s983_s22 = sphi %s1046_s22, %s1355_s22   ;;  %s979_s21 = sphi %s1044_s21, %s1354_s21  }
   0x8   : > { %s89_s28 = sadd.s32 1, %s987_s23  ;;  %p96_p0 = scmp.ne.s32.totalorder %s987_s23, %s983_s22 }
   0x9   : > { %p97_p1 = scmp.eq.s32.totalorder %s999_s26, 0  ;;  %p102_p2 = scmp.ne.s32.totalorder %s983_s22, %s979_s21 }
   0xa   : > { %p1080_p3 = scmp.eq.s32.totalorder %s1321_s27, 0  ;;  %p679_p5 = scmp.ge.s32.totalorder %s999_s26, 1 }
   0xb   : > { %p98_p4 = por %p97_p1, %p96_p0  ;;  %p217_p7 = scmp.lt.s32.totalorder %s999_s26, 7 }
   0xc   : > { %s1331_s29 = scalar_select %p1080_p3, 1, 0 }
   0xd   : > { %p1087_p6 = por %p1080_p3, %p102_p2  ;;  %p1092_p8 = pnand %p679_p5, %p217_p7 }
   0xe   : > { %s1001_s8 = smov [#allocation4]   ;;  %p760_p10 = scmp.lt.s32.totalorder %s999_s26, 6 }
   0xf   : > { %s1332_s30 = scalar_select %p1087_p6, 1, 0 }
  0x10   : > { %s1333_s7 = scalar_select %p1092_p8, 1, 0 }
  0x11   : > { %s232_s9 = sshll.u32 %s1001_s8, 4  ;;  %p744_p9 = pneg %p1092_p8  ;;  %s233_s9 = int_to_ptr.vmem [resolvable:$true] %s232_s9 }
  0x12   : > { %s256_s10 = sand.u32 1, %s999_s26   ;;  %p1106_p12 = pnand %p760_p10, %p98_p4 }
  0x13   : > { %p1102_p11 = pnand %p744_p9, %p1080_p3  ;;  %s1336_s0 = sld [smem:[#allocation16_spill]] }
  0x14   : > { %s1335_s12 = scalar_select %p1106_p12, 1, 0 }
  0x15   : > { %p1323_p0 = pneg %p1102_p11 }
  0x19   : > { %s825_s15 = scalar_lea.hbm %s1336_s0, 128 }
  0x1a   : > { %p826_p13 = scmp.ne.s32.totalorder %s1336_s0, %s825_s15  ;;  %p832_p4 = scmp.lt.u32.totalorder %s825_s15, %s1336_s0 }
  0x1c   : > { %p828_p1 = pnand %p1323_p0, %p826_p13 }
  0x1e   : > { %p829_p2 = pneg %p828_p1 }
  0x20   : > { %p834_p5 = pnand %p832_p4, %p829_p2 }
  0x22   : > { %837 = shalt.err (!%p834_p5)
}
  0x23   : > { %s838_s20 = scalar_lea.vmem %s233_s9, 128  ;;  %p846_p6 = scmp.lt.s32.totalorder %s233_s9, %s233_s9 }
  0x24   : > { %p839_p7 = scmp.ne.s32.totalorder %s233_s9, %s838_s20  ;;  %p847_p3 = scmp.lt.s32.totalorder %s838_s20, %s838_s20 }
  0x26   : > { %p841_p9 = pnand %p839_p7, %p1323_p0  ;;  %p848_p8 = por %p847_p3, %p846_p6 }
  0x28   : > { %p842_p10 = pneg %p841_p9 }
  0x2a   : > { %p849_p12 = pnand %p848_p8, %p842_p10 }
  0x2c   : > { %852 = shalt.err (!%p849_p12)
}
  0x2d   : > { %747 = dma.hbm_to_vmem [thread:$0]  (!%p1102_p11), %s1336_s0, 128, %s233_s9, [#allocation5]  }
  0x2e   : > { %s27_s13 = sadd.s32 1, %s995_s25  ;;  %s258_s14 = sand.u32 1, %s987_s23  }
  0x2f   : > { %p28_p3 = scmp.ge.s32.totalorder %s27_s13, 6  ;;  %s1134_s15 = sshll.u32 %s258_s14, 4 }
  0x30   : > { %s1322_s16 = sshll.u32 %s995_s25, 8  ;;  %s1338_s2 = sld [smem:[#allocation17_spill]] }
  0x31   : > { %s1359_s13 = smov (%p28_p3, %s27_s13), 0  ;;  %s260_s9 = scalar_lea.vmem [#allocation8], %s1134_s15 }
  0x32   : > { %1337 = sst [smem:[#allocation14_spill]] %s1359_s13  ;;  %s267_s20 = sshll.u32 %s260_s9, 4  ;;  %s1149_s20 = int_to_ptr.vmem [resolvable:$true] %s267_s20 }
  0x33   : > { %s86_s21 = ssub.s32 %s995_s25, %s1359_s13  ;;  %s1158_s14 = scalar_lea.sflag [#allocation5], %s256_s10 }
  0x34   : > { %p87_p6 = scmp.eq.s32.totalorder %s86_s21, 0  ;;  %p1340_p12 = scmp.ne.s32.totalorder %s1335_s12, 0 }
  0x36   : > { %s1144_s19 = scalar_lea.hbm %s1338_s2, %s1322_s16  ;;  %p1326_p13 = pneg %p1340_p12 }
  0x37   : > { %s1154_s8 = scalar_select %p87_p6, %s987_s23, %s89_s28  }
  0x38   : > { %s853_s17 = scalar_lea.hbm %s1144_s19, 256  ;;  %s858_s27 = scalar_lea.hbm %s1338_s2, 1536 }
  0x39   : > { %1339 = sst [smem:[#allocation15_spill]] %s1154_s8  ;;  %p854_p8 = scmp.ne.s32.totalorder %s1144_s19, %s853_s17 }
  0x3a   : > { %p859_p4 = scmp.lt.u32.totalorder %s1144_s19, %s1338_s2  ;;  %p860_p5 = scmp.lt.u32.totalorder %s858_s27, %s853_s17 }
  0x3b   : > { %p856_p1 = pnand %p1326_p13, %p854_p8  ;;  %p862_p9 = scmp.lt.u32.totalorder %s853_s17, %s1144_s19 }
  0x3c   : > { %p861_p7 = por %p860_p5, %p859_p4 }
  0x3d   : > { %p857_p2 = pneg %p856_p1 }
  0x3e   : > { %p863_p10 = por %p862_p9, %p861_p7 }
  0x40   : > { %p864_p3 = pnand %p863_p10, %p857_p2 }
  0x42   : > { %867 = shalt.err (!%p864_p3)
}
  0x43   : > { %s868_s28 = scalar_lea.vmem %s1149_s20, 256  ;;  %s1002_s10 = smov [#allocation8]  }
  0x44   : > { %p869_p6 = scmp.ne.s32.totalorder %s1149_s20, %s868_s28  ;;  %s873_s18 = sshll.u32 %s1002_s10, 4  ;;  %s874_s18 = int_to_ptr.vmem [resolvable:$false] %s873_s18 }
  0x45   : > { %s875_s16 = scalar_lea.vmem %s874_s18, 512  ;;  %p876_p0 = scmp.lt.s32.totalorder %s1149_s20, %s874_s18 }
  0x46   : > { %p871_p8 = pnand %p869_p6, %p1326_p13  ;;  %p877_p4 = scmp.lt.s32.totalorder %s875_s16, %s868_s28 }
  0x48   : > { %p872_p1 = pneg %p871_p8  ;;  %p878_p5 = por %p877_p4, %p876_p0 }
  0x4a   : > { %p879_p7 = pnand %p878_p5, %p872_p1 }
  0x4c   : > { %882 = shalt.err (!%p879_p7)
}
  0x4d   : > { %s1003_s27 = smov 64   ;;  %s1004_s17 = smov 4  }
  0x4e   : > { %754 = dma.hbm_to_vmem [thread:$0]  (!%p1340_p12), %s1144_s19, 256, %s1149_s20, %s1158_s14, %s1003_s27, %s1003_s27, %s1004_s17  }
  0x4f   : > { %s1005_s9 = smov [#allocation6]   ;;  %s1341_s28 = sshll.u32 %s995_s25, 8 }
  0x50   : > { %s245_s21 = sshll.u32 %s1005_s9, 4  ;;  %s1194_s16 = scalar_lea.hbm %s1313_s4, %s1341_s28  ;;  %s246_s21 = int_to_ptr.vmem [resolvable:$true] %s245_s21 }
  0x51   : > { %s883_s13 = scalar_lea.hbm %s1310_s1, 128  ;;  %p1342_p2 = pneg %p1102_p11 }
  0x52   : > { %p884_p0 = scmp.ne.s32.totalorder %s1310_s1, %s883_s13  ;;  %p890_p3 = scmp.lt.u32.totalorder %s883_s13, %s1310_s1 }
  0x54   : > { %p886_p9 = pnand %p884_p0, %p1342_p2 }
  0x56   : > { %p887_p10 = pneg %p886_p9 }
  0x58   : > { %p892_p6 = pnand %p890_p3, %p887_p10 }
  0x5a   : > { %895 = shalt.err (!%p892_p6)
}
  0x5b   : > { %s896_s9 = scalar_lea.vmem %s246_s21, 128  ;;  %p1343_p1 = pmov %p1342_p2 }
  0x5c   : > { %p897_p8 = scmp.ne.s32.totalorder %s246_s21, %s896_s9  ;;  %p904_p7 = scmp.lt.s32.totalorder %s246_s21, %s246_s21 }
  0x5d   : > { %p905_p13 = scmp.lt.s32.totalorder %s896_s9, %s896_s9 }
  0x5e   : > { %p899_p4 = pnand %p897_p8, %p1343_p1 }
  0x5f   : > { %p906_p12 = por %p905_p13, %p904_p7 }
  0x60   : > { %p900_p5 = pneg %p899_p4 }
  0x62   : > { %p907_p0 = pnand %p906_p12, %p900_p5 }
  0x64   : > { %910 = shalt.err (!%p907_p0)
}
  0x65   : > { %750 = dma.hbm_to_vmem [thread:$0]  (!%p1102_p11), %s1310_s1, 128, %s246_s21, [#allocation7]  }
  0x66   : > { %s287_s23 = scalar_lea.vmem [#allocation9], %s1134_s15  ;;  %s911_s8 = scalar_lea.hbm %s1194_s16, 256 }
  0x67   : > { %s294_s13 = sshll.u32 %s287_s23, 4  ;;  %p912_p13 = scmp.ne.s32.totalorder %s1194_s16, %s911_s8  ;;  %s1217_s13 = int_to_ptr.vmem [resolvable:$true] %s294_s13 }
  0x68   : > { %p1344_p12 = scmp.ne.s32.totalorder %s1335_s12, 0  ;;  %s916_s10 = scalar_lea.hbm %s1313_s4, 1536 }
  0x69   : > { %p917_p3 = scmp.lt.u32.totalorder %s1194_s16, %s1313_s4  ;;  %p918_p6 = scmp.lt.u32.totalorder %s916_s10, %s911_s8 }
  0x6a   : > { %p1345_p2 = pneg %p1344_p12  ;;  %p920_p8 = scmp.lt.u32.totalorder %s911_s8, %s1194_s16 }
  0x6b   : > { %p919_p11 = por %p918_p6, %p917_p3 }
  0x6c   : > { %p914_p9 = pnand %p912_p13, %p1345_p2 }
  0x6d   : > { %p921_p1 = por %p920_p8, %p919_p11 }
  0x6e   : > { %p915_p10 = pneg %p914_p9 }
  0x70   : > { %p922_p4 = pnand %p921_p1, %p915_p10 }
  0x72   : > { %925 = shalt.err (!%p922_p4)
}
  0x73   : > { %s926_s15 = scalar_lea.vmem %s1217_s13, 256  ;;  %p1346_p7 = pmov %p1345_p2 }
  0x74   : > { %p927_p5 = scmp.ne.s32.totalorder %s1217_s13, %s926_s15  ;;  %s1006_s21 = smov [#allocation9]  }
  0x75   : > { %s931_s20 = sshll.u32 %s1006_s21, 4  ;;  %s932_s20 = int_to_ptr.vmem [resolvable:$false] %s931_s20 }
  0x76   : > { %p929_p0 = pnand %p927_p5, %p1346_p7  ;;  %s933_s9 = scalar_lea.vmem %s932_s20, 512 }
  0x77   : > { %p934_p2 = scmp.lt.s32.totalorder %s1217_s13, %s932_s20  ;;  %p935_p9 = scmp.lt.s32.totalorder %s933_s9, %s926_s15 }
  0x78   : > { %p930_p13 = pneg %p929_p0 }
  0x79   : > { %p936_p3 = por %p935_p9, %p934_p2 }
  0x7b   : > { %p937_p6 = pnand %p936_p3, %p930_p13 }
  0x7d   : > { %940 = shalt.err (!%p937_p6)
}
  0x7e   : > { %757 = dma.hbm_to_vmem [thread:$0]  (!%p1344_p12), %s1194_s16, 256, %s1217_s13, %s1158_s14, %s1003_s27, %s1003_s27, %s1004_s17  }
  0x7f   : > { %p1347_p10 = scmp.ne.s32.totalorder %s1333_s7, 0 }
  0x80   : > { %p1348_p11 = scmp.ne.s32.totalorder (!%p1347_p10), %s1331_s29, 0 }
  0x81   : > { %312 = sbr.rel (%p1347_p10) target bundleno = 537 (0x219), region = 44 }
  0x88   : > { %966 = dma.done.wait (%p1348_p11), [#allocation5], 128  }
  0x89   : > { %968 = vsyncadd (%p1348_p11), [#allocation5], 4294967168 }
  0x8a   : > { %970 = dma.done.wait (%p1348_p11), [#allocation7], 128  }
  0x8b   : > { %972 = vsyncadd (%p1348_p11), [#allocation7], 4294967168  ;;  %s1349_s12 = sadd.s32 4294967295, %s999_s26   ;;  %s324_s27 = sand.u32 1, %s983_s22  }
  0x8c   : > { %s322_s14 = sand.u32 1, %s1349_s12   ;;  %s692_s7 = sshll.u32 %s324_s27, 4 }
  0x8d   : > { %s323_s17 = scalar_lea.sflag [#allocation5], %s322_s14  ;;  %s326_s16 = scalar_lea.vmem [#allocation8], %s692_s7 }
  0x8e   : > { %p1350_p12 = scmp.ne.s32.totalorder %s1332_s30, 0 }
  0x90   : > { %974 = dma.done.wait (%p1350_p12), %s323_s17, 512  }
  0x91   : > { %976 = vsyncadd (%p1350_p12), %s323_s17, 4294966784  ;;  %p374_p8 = scmp.lt.s32.totalorder %s991_s24, 5  ;;  %s335_s28 = scalar_lea.vmem [#allocation9], %s692_s7 }
  0x92   : > { %p694_p1 = scmp.ne.s32.totalorder %s991_s24, 0 }
  0x93   : > { %s1265_s0 = scalar_select %p374_p8, %s991_s24, 5 }
  0x94   : > { %388 = sbr.rel (%p694_p1) target bundleno = 155 (0x9b), region = 64  ;;  %v389_v0 = vld [vmem:[#allocation4] sm:$0xff] (!%p694_p1)  ;;  %v391_v1 = vld [vmem:[#allocation6] sm:$0xff] (!%p694_p1) }
  0x95   : > { %s376_s23 = scalar_lea.vmem %s1312_s3, %s1265_s0  ;;  %s379_s11 = scalar_lea.vmem %s1314_s5, %s1265_s0  ;;  %390 = vst [vmem:[#allocation2] sm:$0xff] (!%p694_p1), %v389_v0  ;;  %392 = vst [vmem:[#allocation3] sm:$0xff] (!%p694_p1), %v391_v1 }
  0x9b PF: > { %v817_v2 = vld [vmem:[%s326_s16] sm:$0xff]   ;;  %v1007_v3 = vmov 0.0   ;;  %v819_v5 = vld [vmem:[%s326_s16 + $0x8] sm:$0xff]   ;;  %vm1008_vm0 = vmmov 0   ;;  %vm418_vm1 = vcmask 261120   ;;  %p703_p4 = scmp.ge.s32.totalorder %s991_s24, 5 }
  0x9c   : > { %716 = vmatprep.subr.bf16.mxu0 %v1007_v3  ;;  %724 = vmatprep.subr.bf16.mxu1 %v1007_v3  ;;  %v818_v4 = vld [vmem:[%s335_s28] sm:$0xff]   ;;  %v820_v6 = vld [vmem:[%s335_s28 + $0x8] sm:$0xff]  }
  0x9d   : > { %717 = vmatpush3.bf16.msra.mxu0 %v817_v2  ;;  %720 = vmatprep.mubr.msk.bf16.mxu0 %vm1008_vm0, %v1007_v3  ;;  %v393_v7 = vld [vmem:[#allocation2] sm:$0xff]  ;;  %v462_v8 = vld [vmem:[#allocation3] sm:$0xff] }
  0x9e   : > { %725 = vmatpush3.bf16.msra.mxu1 %v818_v4  ;;  %718 = vmatprep.subr.bf16.mxu0 %v1007_v3  ;;  %v394_v9 = vpack.c.bf16 %v393_v7, %v393_v7  ;;  %v463_v10 = vpack.c.bf16 %v462_v8, %v462_v8  ;;  %v695_v11 = vld [vmem:[%s376_s23] ss:$0 sm:$0xff] }
  0x9f   : > { %726 = vmatprep.subr.bf16.mxu1 %v1007_v3  ;;  %728 = vmatprep.mubr.msk.bf16.mxu1 %vm1008_vm0, %v1007_v3  ;;  %v699_v12 = vld [vmem:[%s379_s11] ss:$0 sm:$0xff] }
  0xa1   : > { %719 = vmatpush3.bf16.msra.mxu0 %v819_v5 }
  0xa2   : > { %727 = vmatpush3.bf16.msra.mxu1 %v820_v6 }
  0xa4   : > { %721 = vmatmul.mubr.msk.bf16.vlgmr.msra.gmra.mrb[0].mxu0 %vm418_vm1, %v394_v9 }
  0xa5   : > { %729 = vmatmul.mubr.msk.bf16.vlgmr.msra.gmra.mrb[0].mxu1 %vm418_vm1, %v463_v10 }
 0x175   : > { %533 = sbr.rel (%p703_p4) target bundleno = 391 (0x187), region = 68 }
 0x177   : > { %v456_v13 = vpop.f32.mrb[0].mxu0 }
 0x178   : > { %v457_v14 = vadd.f32 %v695_v11, %v456_v13  ;;  %v524_v15 = vpop.f32.mrb[0].mxu1  ;;  %v722_v16 = vpop.f32.mrb[1].mxu0 }
 0x179   : > { %v525_v17 = vadd.f32 %v699_v12, %v524_v15  ;;  %v730_v18 = vpop.f32.mrb[1].mxu1  ;;  %v459_v19 = vpop.f32.mrb[2].mxu0 }
 0x17a   : > { %v527_v20 = vpop.f32.mrb[2].mxu1  ;;  %v723_v21 = vpop.f32.mrb[3].mxu0  ;;  %821 = vtanh.f32 (!%p703_p4), %v457_v14 }
 0x17b   : > { %v731_v22 = vpop.f32.mrb[3].mxu1  ;;  %823 = vtanh.f32 (!%p703_p4), %v525_v17 }
 0x184   : > { %v822_v23 = vpop.eup %821 }
 0x185   : > { %v824_v24 = vpop.eup %823  ;;  %535 = vst [vmem:[#allocation2] sm:$0xff] %v822_v23 }
 0x186   : > { %537 = vst [vmem:[#allocation3] sm:$0xff] %v824_v24 }
 0x187 PF: > { %p704_p5 = scmp.ne.s32.totalorder %s991_s24, 5 }
 0x188   : > { %v542_v25 = vmul.f32 (!%p704_p5), %v525_v17, %v457_v14  ;;  %vm545_vm2 = vcmask (!%p704_p5), 7168  }
 0x189   : > { %541 = sbr.rel (%p704_p5) target bundleno = 537 (0x219), region = 72 }
 0x18a   : > { %543 = vadd.xlane.f32.xlu0 (!%p704_p5), %v542_v25 }
 0x217   : > { %v544_v26 = vpop.xlane.xlu0 %543 }
 0x218   : > { %546 = vst.msk [vmem:[%s1315_s6] sm:$0xff] %vm545_vm2, %v544_v26 }
 0x219 PF: > { %s18_s26 = sadd.s32 1, %s999_s26   ;;  %s1351_s20 = sld [smem:[#allocation13_spill]] }
 0x21a   : > { %p15_p7 = scmp.ge.s32.totalorder %s18_s26, 8   ;;  %s1352_s23 = sld [smem:[#allocation15_spill]] }
 0x21b   : > { %s1353_s9 = sld [smem:[#allocation14_spill]]  ;;  %s1354_s21 = smov %s983_s22 }
 0x21c   : > { %s1356_s24 = smov %s995_s25  ;;  %17 = sbr.rel (!%p15_p7) target bundleno = 7 (0x7), region = 122 }
 0x21f   : > { %s1355_s22 = smov %s1351_s20 }
 0x221   : > { %s1357_s25 = smov %s1353_s9 }
 0x223   :  { %566 = vsyncpa [#allocation5], 1 }
 0x224   :  { %568 = vsyncpa [#allocation5 + $0x1], 1 }
 0x225   :  { %569 = vsyncpa [#allocation7], 1 }

</bundles_post_ra>
